<compile_context>
chip_gen: v6e
topology: v6e:2x2x1
jax: 0.10.0
libtpu: 0.0.40
codegen_flags: <defaults>
</compile_context>

<pallas_src>
import jax
import jax.numpy as jnp
from jax.experimental import pallas as pl
from jax.experimental.pallas import tpu as pltpu


def _round_up(n, m):
    return ((n + m - 1) // m) * m


def _mlp_kernel(xt_ref, w1_ref, b1_ref, w2_ref, b2_ref, w3_ref, b3_ref, o_ref):
    # xt_ref: (input_size, TB) -- batch on the 128-lane axis.
    # w*: PyTorch-native (out_features, in_features); b*: (out_features, 1).
    x_t = xt_ref[...]
    # fc1 + ReLU  -> (32, TB)
    h1 = jnp.dot(w1_ref[...], x_t, preferred_element_type=jnp.float32)
    h1 = jnp.maximum(h1 + b1_ref[...], 0.0)
    # fc2 + ReLU  -> (8, TB)
    h2 = jnp.dot(w2_ref[...], h1, preferred_element_type=jnp.float32)
    h2 = jnp.maximum(h2 + b2_ref[...], 0.0)
    # fc3 (no activation) -> (1, TB), lane-dense store
    h3 = jnp.dot(w3_ref[...], h2, preferred_element_type=jnp.float32)
    o_ref[...] = (h3 + b3_ref[...]).astype(o_ref.dtype)


def regression_model_forward(x, params, *, block_batch=8192):
    """x: (B, input_size) float32.  Returns (B, 1) float32.

    params: w1 (32,in), b1 (32,1), w2 (8,32), b2 (8,1), w3 (1,8), b3 (1,1)
    (i.e. PyTorch-native nn.Linear weight layout, biases as column vectors).
    """
    B, input_size = x.shape
    w1, b1 = params["w1"], params["b1"]
    w2, b2 = params["w2"], params["b2"]
    w3, b3 = params["w3"], params["b3"]

    # Batch tile: multiple of 128 lanes, no larger than the (padded) batch.
    tb = _round_up(min(block_batch, _round_up(B, 128)), 128)
    b_pad = _round_up(B, tb)
    n_tiles = b_pad // tb

    # Batch-on-lanes layout; pad batch with zero columns (sliced off below).
    xt = jnp.transpose(x)  # (input_size, B)
    if b_pad != B:
        xt = jnp.pad(xt, ((0, 0), (0, b_pad - B)))

    # Weights/biases: full-array blocks, constant index map -> VMEM-resident.
    def const_spec(arr):
        return pl.BlockSpec(arr.shape, lambda i: (0,) * arr.ndim)

    out_t = pl.pallas_call(
        _mlp_kernel,
        out_shape=jax.ShapeDtypeStruct((1, b_pad), jnp.float32),
        grid=(n_tiles,),
        in_specs=[
            pl.BlockSpec((input_size, tb), lambda i: (0, i)),  # x^T tile
            const_spec(w1), const_spec(b1),
            const_spec(w2), const_spec(b2),
            const_spec(w3), const_spec(b3),
        ],
        out_specs=pl.BlockSpec((1, tb), lambda i: (0, i)),
        compiler_params=pltpu.CompilerParams(
            dimension_semantics=("parallel",),  # megacore sharding on v7x
        ),
    )(xt, w1, b1, w2, b2, w3, b3)

    # Back to PyTorch-style (B, 1).
    return out_t[:, :B].T


def init_params(key, input_size):
    """nn.Linear-style init: uniform(-1/sqrt(fan_in), 1/sqrt(fan_in)).

    Weights stored in PyTorch-native (out_features, in_features) layout,
    biases as (out_features, 1) column vectors (broadcast over batch lanes).
    """
    def linear(k, fan_in, fan_out):
        kw, kb = jax.random.split(k)
        bound = 1.0 / jnp.sqrt(fan_in)
        w = jax.random.uniform(kw, (fan_out, fan_in), jnp.float32, -bound, bound)
        b = jax.random.uniform(kb, (fan_out, 1), jnp.float32, -bound, bound)
        return w, b

    k1, k2, k3 = jax.random.split(key, 3)
    w1, b1 = linear(k1, input_size, 32)
    w2, b2 = linear(k2, 32, 8)
    w3, b3 = linear(k3, 8, 1)
    return {"w1": w1, "b1": b1, "w2": w2, "b2": b2, "w3": w3, "b3": b3}


def reference_forward(x, params):
    """Pure-JAX reference (matches PyTorch x @ W.T + b semantics)."""
    h = jnp.maximum(x @ params["w1"].T + params["b1"].T, 0.0)
    h = jnp.maximum(h @ params["w2"].T + params["b2"].T, 0.0)
    return h @ params["w3"].T + params["b3"].T


if __name__ == "__main__":
    key = jax.random.PRNGKey(0)
    k_x, k_p = jax.random.split(key)

    batch = 500       # deliberately not a multiple of the tile -> exercises padding
    input_size = 16   # e.g. number of features describing parking-slot context

    x = jax.random.normal(k_x, (batch, input_size), dtype=jnp.float32)
    params = init_params(k_p, input_size)

    # Small tile so the test runs >1 grid step (pipelining + last-tile padding).
    out = regression_model_forward(x, params, block_batch=256)
    out = jax.block_until_ready(out)

    ref = reference_forward(x, params)
    assert out.shape == (batch, 1), out.shape
    max_err = jnp.max(jnp.abs(out - ref))
    assert jnp.allclose(out, ref, atol=1e-4, rtol=1e-4), f"mismatch: max abs err {max_err}"

    print("KERNEL_OK")
</pallas_src>

<mosaic_0001>
module attributes {stable_mosaic.version = 11 : i64} {
  func.func @_mlp_kernel(%arg0: i32, %arg1: memref<16x256xf32, #tpu.memory_space<vmem>>, %arg2: memref<32x16xf32, #tpu.memory_space<vmem>>, %arg3: memref<32x1xf32, #tpu.memory_space<vmem>>, %arg4: memref<8x32xf32, #tpu.memory_space<vmem>>, %arg5: memref<8x1xf32, #tpu.memory_space<vmem>>, %arg6: memref<1x8xf32, #tpu.memory_space<vmem>>, %arg7: memref<1x1xf32, #tpu.memory_space<vmem>>, %arg8: memref<1x256xf32, #tpu.memory_space<vmem>>) attributes {dimension_semantics = [#tpu.dimension_semantics<parallel>], iteration_bounds = array<i64: 2>, scalar_prefetch = 0 : i64, scratch_operands = 0 : i64, tpu.core_type = #tpu.core_type<tc>, window_params = [{transform_indices = @transform_0, window_bounds = array<i64: 16, 256>}, {pipeline_mode = #tpu.pipeline_mode<synchronous>, transform_indices = @transform_1, window_bounds = array<i64: 32, 16>}, {pipeline_mode = #tpu.pipeline_mode<synchronous>, transform_indices = @transform_2, window_bounds = array<i64: 32, 1>}, {pipeline_mode = #tpu.pipeline_mode<synchronous>, transform_indices = @transform_3, window_bounds = array<i64: 8, 32>}, {pipeline_mode = #tpu.pipeline_mode<synchronous>, transform_indices = @transform_4, window_bounds = array<i64: 8, 1>}, {pipeline_mode = #tpu.pipeline_mode<synchronous>, transform_indices = @transform_5, window_bounds = array<i64: 1, 8>}, {pipeline_mode = #tpu.pipeline_mode<synchronous>, transform_indices = @transform_6, window_bounds = array<i64: 1, 1>}, {transform_indices = @transform_7, window_bounds = array<i64: 1, 256>}]} {
    %c0 = arith.constant 0 : index
    %c0_0 = arith.constant 0 : index
    %0 = vector.load %arg1[%c0, %c0_0] : memref<16x256xf32, #tpu.memory_space<vmem>>, vector<16x256xf32>
    %c0_1 = arith.constant 0 : index
    %c0_2 = arith.constant 0 : index
    %1 = vector.load %arg2[%c0_1, %c0_2] : memref<32x16xf32, #tpu.memory_space<vmem>>, vector<32x16xf32>
    %cst = arith.constant dense<0.000000e+00> : vector<32x256xf32>
    %2 = tpu.matmul %1, %0, %cst {dimension_numbers = #tpu.dot_dimension_numbers<[1], [0], [0], [1], [0, 0, 1, 1], [], []>} : vector<32x16xf32>, vector<16x256xf32>, vector<32x256xf32> -> vector<32x256xf32>
    %c0_3 = arith.constant 0 : index
    %c0_4 = arith.constant 0 : index
    %3 = vector.load %arg3[%c0_3, %c0_4] : memref<32x1xf32, #tpu.memory_space<vmem>>, vector<32x1xf32>
    %4 = vector.broadcast %3 : vector<32x1xf32> to vector<32x256xf32>
    %5 = arith.addf %2, %4 : vector<32x256xf32>
    %cst_5 = arith.constant 0.000000e+00 : f32
    %6 = vector.broadcast %cst_5 : f32 to vector<32x256xf32>
    %7 = arith.maximumf %5, %6 : vector<32x256xf32>
    %c0_6 = arith.constant 0 : index
    %c0_7 = arith.constant 0 : index
    %8 = vector.load %arg4[%c0_6, %c0_7] : memref<8x32xf32, #tpu.memory_space<vmem>>, vector<8x32xf32>
    %cst_8 = arith.constant dense<0.000000e+00> : vector<8x256xf32>
    %9 = tpu.matmul %8, %7, %cst_8 {dimension_numbers = #tpu.dot_dimension_numbers<[1], [0], [0], [1], [0, 0, 1, 1], [], []>} : vector<8x32xf32>, vector<32x256xf32>, vector<8x256xf32> -> vector<8x256xf32>
    %c0_9 = arith.constant 0 : index
    %c0_10 = arith.constant 0 : index
    %10 = vector.load %arg5[%c0_9, %c0_10] : memref<8x1xf32, #tpu.memory_space<vmem>>, vector<8x1xf32>
    %11 = vector.broadcast %10 : vector<8x1xf32> to vector<8x256xf32>
    %12 = arith.addf %9, %11 : vector<8x256xf32>
    %cst_11 = arith.constant 0.000000e+00 : f32
    %13 = vector.broadcast %cst_11 : f32 to vector<8x256xf32>
    %14 = arith.maximumf %12, %13 : vector<8x256xf32>
    %c0_12 = arith.constant 0 : index
    %c0_13 = arith.constant 0 : index
    %15 = vector.load %arg6[%c0_12, %c0_13] : memref<1x8xf32, #tpu.memory_space<vmem>>, vector<1x8xf32>
    %cst_14 = arith.constant dense<0.000000e+00> : vector<1x256xf32>
    %16 = tpu.matmul %15, %14, %cst_14 {dimension_numbers = #tpu.dot_dimension_numbers<[1], [0], [0], [1], [0, 0, 1, 1], [], []>} : vector<1x8xf32>, vector<8x256xf32>, vector<1x256xf32> -> vector<1x256xf32>
    %c0_15 = arith.constant 0 : index
    %c0_16 = arith.constant 0 : index
    %17 = vector.load %arg7[%c0_15, %c0_16] : memref<1x1xf32, #tpu.memory_space<vmem>>, vector<1x1xf32>
    %18 = vector.broadcast %17 : vector<1x1xf32> to vector<1x256xf32>
    %19 = arith.addf %16, %18 : vector<1x256xf32>
    %c0_17 = arith.constant 0 : index
    %c0_18 = arith.constant 0 : index
    %20 = vector.load %arg8[%c0_17, %c0_18] : memref<1x256xf32, #tpu.memory_space<vmem>>, vector<1x256xf32>
    tpu.vector_store %arg8[%c0_17, %c0_18], %19 {strides = array<i32>} : memref<1x256xf32, #tpu.memory_space<vmem>>, vector<1x256xf32>,
    return
  }
  func.func @transform_0(%arg0: i32) -> (i32, i32) {
    %c0_i32 = arith.constant 0 : i32
    %c0_i32_0 = arith.constant 0 : i32
    return %c0_i32, %arg0 : i32, i32
  }
  func.func @transform_1(%arg0: i32) -> (i32, i32) {
    %c0_i32 = arith.constant 0 : i32
    %c0_i32_0 = arith.constant 0 : i32
    %c0_i32_1 = arith.constant 0 : i32
    return %c0_i32, %c0_i32_0 : i32, i32
  }
  func.func @transform_2(%arg0: i32) -> (i32, i32) {
    %c0_i32 = arith.constant 0 : i32
    %c0_i32_0 = arith.constant 0 : i32
    %c0_i32_1 = arith.constant 0 : i32
    return %c0_i32, %c0_i32_0 : i32, i32
  }
  func.func @transform_3(%arg0: i32) -> (i32, i32) {
    %c0_i32 = arith.constant 0 : i32
    %c0_i32_0 = arith.constant 0 : i32
    %c0_i32_1 = arith.constant 0 : i32
    return %c0_i32, %c0_i32_0 : i32, i32
  }
  func.func @transform_4(%arg0: i32) -> (i32, i32) {
    %c0_i32 = arith.constant 0 : i32
    %c0_i32_0 = arith.constant 0 : i32
    %c0_i32_1 = arith.constant 0 : i32
    return %c0_i32, %c0_i32_0 : i32, i32
  }
  func.func @transform_5(%arg0: i32) -> (i32, i32) {
    %c0_i32 = arith.constant 0 : i32
    %c0_i32_0 = arith.constant 0 : i32
    %c0_i32_1 = arith.constant 0 : i32
    return %c0_i32, %c0_i32_0 : i32, i32
  }
  func.func @transform_6(%arg0: i32) -> (i32, i32) {
    %c0_i32 = arith.constant 0 : i32
    %c0_i32_0 = arith.constant 0 : i32
    %c0_i32_1 = arith.constant 0 : i32
    return %c0_i32, %c0_i32_0 : i32, i32
  }
  func.func @transform_7(%arg0: i32) -> (i32, i32) {
    %c0_i32 = arith.constant 0 : i32
    %c0_i32_0 = arith.constant 0 : i32
    return %c0_i32, %arg0 : i32, i32
  }
}

</mosaic_0001>

<bundles_post_ra>
// kernel: tpu_custom_call.1
= control target key start
LH: loop header
LB: loop body
LE: loop exit
PB: predicated region body
PF: predicated region fallthrough
CT: control target
= control target key end

     0   :  { %s1037_s0 = inlined_call_operand.vmem [shape: f32[16,512], index: 0, kind: input, shape index: {}]   ;;  %s1038_s1 = inlined_call_operand.vmem [shape: f32[32,16], index: 1, kind: input, shape index: {}]   ;;  %s1039_s2 = inlined_call_operand.vmem [shape: f32[32,1], index: 2, kind: input, shape index: {}]   ;;  %s1040_s3 = inlined_call_operand.vmem [shape: f32[8,32], index: 3, kind: input, shape index: {}]   ;;  %s1041_s4 = inlined_call_operand.vmem [shape: f32[8,1], index: 4, kind: input, shape index: {}]   ;;  %s1042_s5 = inlined_call_operand.vmem [shape: f32[1,8], index: 5, kind: input, shape index: {}]   ;;  %s1043_s6 = inlined_call_operand.<no memory space> [shape: f32[1,1], index: 6, kind: input, shape index: {}]   ;;  %s1044_s7 = inlined_call_operand.hbm [shape: f32[1,512], index: 7, kind: output, shape index: {}]  }
   0x1   :  { %v12_v0 = vstv %s1043_s6 }
   0x2   :  { %13 = vst [vmem:[#allocation2] sm:$0x1] %v12_v0 }
   0x3   :  { %14 = vsyncpa [#allocation5], 0 }
   0x4   :  { %16 = vsyncpa [#allocation5 + $0x1], 0  ;;  %s897_s26 = smov 0   ;;  %s899_s27 = smov 0  }
   0x5   :  { %s901_s28 = smov 0   ;;  %s903_s29 = smov 0  }
   0x6 LB: > { %s721_s6 = sadd.s32 4294967295, %s848_s29   ;;  %s722_s30 = sadd.s32 4294967294, %s848_s29   ;;  %s848_s29 = sphi %s903_s29, %s1052_s29   ;;  %s844_s28 = sphi %s901_s28, %s1051_s28   ;;  %s840_s27 = sphi %s899_s27, %s1050_s27   ;;  %s836_s26 = sphi %s897_s26, %s1049_s26  }
   0x7   : > { %s920_s8 = sadd.s32 1, %s848_s29   ;;  %s29_s9 = sadd.s32 1, %s844_s28 }
   0x8   : > { %s26_s10 = ssub.s32 %s848_s29, %s920_s8  ;;  %p36_p0 = scmp.ne.s32.totalorder %s844_s28, %s840_s27 }
   0x9   : > { %p27_p1 = scmp.eq.s32.totalorder %s26_s10, 0  ;;  %p37_p2 = scmp.eq.s32.totalorder %s848_s29, 0 }
   0xa   : > { %p192_p3 = scmp.eq.s32.totalorder %s721_s6, 1  ;;  %p197_p4 = scmp.ne.s32.totalorder %s840_s27, %s836_s26 }
   0xb   : > { %s933_s11 = scalar_select %p27_p1, %s844_s28, %s29_s9  }
   0xc   : > { %p38_p5 = por %p37_p2, %p36_p0  ;;  %p935_p6 = por %p192_p3, %p36_p0 }
   0xd   : > { %p198_p7 = scmp.eq.s32.totalorder %s722_s30, 1  ;;  %p1045_p9 = scmp.ge.s32.totalorder %s848_s29, 2 }
   0xf   : > { %p939_p8 = por %p198_p7, %p197_p4  ;;  %232 = sbr.rel (%p1045_p9) target bundleno = 26 (0x1a), region = 40 }
  0x14   : > { %235 = sbr.rel (!%p38_p5) target bundleno = 26 (0x1a), region = 44  ;;  %s237_s14 = sand.u32 (%p38_p5), 1, %s844_s28  }
  0x15   : > { %s742_s15 = sshll.u32 (%p38_p5), %s848_s29, 4  ;;  %s725_s16 = sshll.u32 (%p38_p5), %s237_s14, 5 }
  0x16   : > { %s242_s19 = scalar_lea.vmem (%p38_p5), %s1037_s0, %s742_s15  ;;  %s239_s20 = scalar_lea.vmem (%p38_p5), [#allocation3], %s725_s16 }
  0x17   : > { %v255_v1 = vld [vmem:[%s242_s19] sm:$0xff] (%p38_p5)  ;;  %v257_v2 = vld [vmem:[%s242_s19 + $0x8] sm:$0xff] (%p38_p5) }
  0x18   : > { %v259_v3 = vld [vmem:[%s242_s19 + $0x20] sm:$0xff] (%p38_p5)  ;;  %256 = vst [vmem:[%s239_s20] sm:$0xff] (%p38_p5), %v255_v1  ;;  %258 = vst [vmem:[%s239_s20 + $0x8] sm:$0xff] (%p38_p5), %v257_v2  ;;  %v261_v4 = vld [vmem:[%s242_s19 + $0x28] sm:$0xff] (%p38_p5) }
  0x19   : > { %260 = vst [vmem:[%s239_s20 + $0x10] sm:$0xff] %v259_v3  ;;  %262 = vst [vmem:[%s239_s20 + $0x18] sm:$0xff] %v261_v4 }
  0x1a PF: > { %p728_p10 = scmp.ge.s32.totalorder %s848_s29, 1  ;;  %p267_p11 = scmp.lt.s32.totalorder %s848_s29, 3 }
  0x1c   : > { %p268_p12 = pnand %p728_p10, %p267_p11 }
  0x1d   : > { %s954_s21 = sand.u32 (!%p268_p12), 1, %s840_s27   ;;  %s743_s18 = sshll.u32 (!%p268_p12), %s721_s6, 5 }
  0x1e   : > { %271 = sbr.rel (%p268_p12) target bundleno = 679 (0x2a7), region = 67  ;;  %s729_s22 = sshll.u32 (!%p268_p12), %s954_s21, 5 }
  0x1f   : > { %s276_s9 = scalar_lea.vmem (!%p268_p12), [#allocation3], %s729_s22  ;;  %s730_s17 = sshll.u32 (!%p268_p12), %s954_s21, 1 }
  0x20   : > { %s304_s19 = scalar_lea.vmem (!%p268_p12), [#allocation4], %s730_s17  ;;  %s655_s24 = scalar_lea.hbm (!%p268_p12), %s1044_s7, %s743_s18 }
  0x21   : > { %s657_s20 = sshll.u32 (!%p268_p12), %s304_s19, 4  ;;  %s643_s25 = scalar_lea.sflag (!%p268_p12), [#allocation5], %s954_s21  ;;  %s658_s20 = int_to_ptr.vmem [resolvable:$true] %s657_s20 }
  0x22   : > { %s788_s30 = scalar_lea.vmem (!%p268_p12), %s658_s20, 32 }
  0x23   : > { %v850_v5 = vmov 0.0   ;;  %v316_v6 = vld [vmem:[%s1039_s2 + $0x8] sm:$0xff]  ;;  %v851_v7 = vmov 0   ;;  %v318_v8 = vld [vmem:[%s1039_s2 + $0x18] sm:$0xff]  ;;  %v315_v13 = vld [vmem:[%s1039_s2] sm:$0xff]  ;;  %vm339_vm0 = vcmask 130048   ;;  %v540_v58 = vlaneseq  ;;  %p789_p13 = scmp.ne.s32.totalorder %s658_s20, %s788_s30 }
  0x24   : > { %416 = vmatprep.mubr.f32.mxu0 %v850_v5  ;;  %524 = vmatprep.mubr.f32.mxu1 %v850_v5  ;;  %v310_v9 = vld [vmem:[%s276_s9 + $0x18] sm:$0xff]  ;;  %v309_v10 = vld [vmem:[%s276_s9 + $0x10] sm:$0xff]  ;;  %v308_v11 = vld [vmem:[%s276_s9 + $0x8] sm:$0xff]  ;;  %vm456_vm1 = vcmask 261120   ;;  %vm544_vm2 = vcmask 64512  }
  0x25   : > { %787 = vset.pattern.permute.xlu1 %v851_v7  ;;  %786 = vset.pattern.permute.xlu0 %v851_v7  ;;  %v307_v12 = vld [vmem:[%s276_s9] sm:$0xff]  ;;  %v317_v15 = vld [vmem:[%s1039_s2 + $0x10] sm:$0xff]  ;;  %v534_v16 = vld [vmem:[#allocation2] sm:$0x1]  ;;  %v541_v59 = vshrl.u32 %v540_v58, 7  ;;  %vm639_vm3 = vcmp.lt.s32.totalorder %v540_v58, 256  ;;  %p790_p0 = pnand %p789_p13, %p935_p6 }
  0x26   : > { %326 = vperm.xlu1 %787, %v316_v6   ;;  %336 = vperm.xlu0 %786, %v318_v8   ;;  %v311_v14 = vld [vmem:[%s1038_s1] sm:$0xff]  ;;  %v312_v17 = vld [vmem:[%s1038_s1 + $0x8] sm:$0xff]  ;;  %v313_v19 = vld [vmem:[%s1038_s1 + $0x10] sm:$0xff]  ;;  %v852_v60 = vmov 1966171168   ;;  %s853_s9 = smov [#allocation4]  }
  0x27   : > { %380 = vmatprep.subr.mxu0 %v310_v9  ;;  %v450_v18 = vld [vmem:[%s1041_s4] sm:$0xff]  ;;  %v314_v20 = vld [vmem:[%s1038_s1 + $0x18] sm:$0xff]  ;;  %v623_v61 = vunpack.c.l.s4 %v852_v60  ;;  %v542_v62 = vsub.s32 0, %v541_v59  ;;  %p791_p1 = pneg %p790_p0  ;;  %s792_s10 = sshll.u32 %s853_s9, 4  ;;  %s793_s10 = int_to_ptr.vmem [resolvable:$false] %s792_s10 }
  0x28   : > { %381 = vmatpush1.msra.mxu0 %v309_v10  ;;  %v449_v49 = vld [vmem:[%s1040_s3] sm:$0xff]  ;;  %s794_s6 = scalar_lea.vmem %s793_s10, 64  ;;  %p795_p2 = scmp.lt.s32.totalorder %s658_s20, %s793_s10 }
  0x29   : > { %382 = vmatprep.subr.mxu0 %v308_v11  ;;  %v533_v57 = vld [vmem:[%s1042_s5] sm:$0x1]  ;;  %v624_v0 = vunpack.c.0.s8 %v623_v61  ;;  %p796_p3 = scmp.lt.s32.totalorder %s794_s6, %s788_s30 }
  0x2a   : > { %383 = vmatpush1.msra.mxu0 %v307_v12  ;;  %321 = vperm.xlu1 %787, %v315_v13  }
  0x2b   : > { %731 = vmatmul.mubr.msk.f32.vlgmr.msra.gmra.mxu0 %vm339_vm0, %v311_v14  ;;  %331 = vperm.xlu0 %786, %v317_v15   ;;  %v627_v6 = vsub.s32 %v624_v0, %v541_v59  ;;  %p797_p4 = por %p796_p3, %p795_p2 }
  0x2c   : > { %422 = vmatprep.mubr.f32.mxu0 %v850_v5 }
  0x2d   : > { %p798_p5 = pnand %p797_p4, %p791_p1 }
  0x2e   : > { %537 = vperm.xlu1 %787, %v534_v16  }
  0x2f   : > { %732 = vmatmul.mubr.msk.f32.gmra.mxu0 %vm339_vm0, %v312_v17  ;;  %453 = vperm.xlu0 %786, %v450_v18  }
  0x30   : > { %428 = vmatprep.mubr.f32.mxu0 %v850_v5 }
  0x33   : > { %733 = vmatmul.mubr.msk.f32.gmra.mxu0 %vm339_vm0, %v313_v19 }
  0x34   : > { %434 = vmatprep.mubr.f32.mxu0 %v850_v5 }
  0x37   : > { %734 = vmatmul.mubr.msk.f32.gmra.mxu0 %vm339_vm0, %v314_v20 }
  0xa1   : > { %v337_v25 = vpop.permute.xlu0 %336  ;;  %v327_v28 = vpop.permute.xlu1 %326 }
  0xa5   : > { %v322_v36 = vpop.permute.xlu1 %321 }
  0xa6   : > { %v332_v30 = vpop.permute.xlu0 %331 }
  0xa9   : > { %v538_v63 = vpop.permute.xlu1 %537 }
  0xaa   : > { %v454_v51 = vpop.permute.xlu0 %453  ;;  %v543_v2 = vrot.slane %v538_v63, %v542_v62 }
  0xeb   : > { %v418_v21 = vpop.f32.mrf.mxu0 }
  0xec   : > { %v419_v43 = vadd.f32 %v418_v21, %v322_v36 }
  0xed   : > { %v420_v22 = vpop.f32.mrf.mxu0 }
  0xee   : > { %v421_v41 = vadd.f32 %v420_v22, %v322_v36  ;;  %v441_v48 = vmax.f32 %v419_v43, 0.0 }
  0xef   : > { %v424_v23 = vpop.f32.mrf.mxu0 }
  0xf0   : > { %v425_v39 = vadd.f32 %v424_v23, %v327_v28  ;;  %v442_v47 = vmax.f32 %v421_v41, 0.0 }
  0xf1   : > { %v426_v24 = vpop.f32.mrf.mxu0 }
  0xf2   : > { %v427_v37 = vadd.f32 %v426_v24, %v327_v28  ;;  %v443_v46 = vmax.f32 %v425_v39, 0.0 }
  0xf3   : > { %v430_v26 = vpop.f32.mrf.mxu0 }
  0xf4   : > { %v431_v35 = vadd.f32 %v430_v26, %v332_v30  ;;  %v444_v45 = vmax.f32 %v427_v37, 0.0 }
  0xf5   : > { %v432_v27 = vpop.f32.mrf.mxu0 }
  0xf6   : > { %v433_v33 = vadd.f32 %v432_v27, %v332_v30  ;;  %v445_v44 = vmax.f32 %v431_v35, 0.0 }
  0xf7   : > { %v436_v29 = vpop.f32.mrf.mxu0 }
  0xf8   : > { %v437_v31 = vadd.f32 %v436_v29, %v337_v25  ;;  %v446_v42 = vmax.f32 %v433_v33, 0.0 }
  0xf9   : > { %v438_v32 = vpop.f32.mrf.mxu0 }
  0xfa   : > { %v439_v34 = vadd.f32 %v438_v32, %v337_v25  ;;  %v447_v40 = vmax.f32 %v437_v31, 0.0 }
  0xfc   : > { %v448_v38 = vmax.f32 %v439_v34, 0.0 }
  0xfe   : > { %484 = vmatprep.subr.mxu1 %v448_v38 }
  0xff   : > { %485 = vmatpush1.msra.mxu1 %v447_v40 }
 0x100   : > { %486 = vmatprep.subr.mxu1 %v446_v42 }
 0x101   : > { %487 = vmatpush1.msra.mxu1 %v445_v44 }
 0x102   : > { %488 = vmatprep.subr.mxu1 %v444_v45 }
 0x103   : > { %489 = vmatpush1.msra.mxu1 %v443_v46 }
 0x104   : > { %490 = vmatprep.subr.mxu1 %v442_v47 }
 0x105   : > { %491 = vmatpush1.msra.mxu1 %v441_v48 }
 0x106   : > { %735 = vmatmul.mubr.msk.f32.vlgmr.msra.gmra.mxu1 %vm456_vm1, %v449_v49 }
 0x107   : > { %612 = vmatprep.mubr.f32.mxu1 %v850_v5 }
 0x1c6   : > { %v526_v50 = vpop.f32.mrf.mxu1 }
 0x1c7   : > { %v527_v52 = vadd.f32 %v526_v50, %v454_v51 }
 0x1c8   : > { %v528_v53 = vpop.f32.mrf.mxu1 }
 0x1c9   : > { %v529_v54 = vadd.f32 %v528_v53, %v454_v51  ;;  %v531_v56 = vmax.f32 %v527_v52, 0.0 }
 0x1cb   : > { %v532_v55 = vmax.f32 %v529_v54, 0.0 }
 0x1cd   : > { %578 = vmatprep.subr.mxu1 %v532_v55 }
 0x1ce   : > { %579 = vmatpush1.msra.mxu1 %v531_v56 }
 0x1cf   : > { %736 = vmatmul.mubr.msk.f32.vlgmr.msra.gmra.mxu1 %vm544_vm2, %v533_v57 }
 0x28f   : > { %v614_v1 = vpop.f32.mrf.mxu1 }
 0x290   : > { %v615_v4 = vadd.f32 %v614_v1, %v543_v2 }
 0x291   : > { %v616_v3 = vpop.f32.mrf.mxu1 }
 0x292   : > { %v617_v5 = vadd.f32 %v616_v3, %v543_v2 }
 0x294   : > { %v621_v7 = vcombine.low %v615_v4, %v617_v5 }
 0x296   : > { %v628_v8 = vrot.slane %v621_v7, %v627_v6 }
 0x298   : > { %v635_v9 = vrot.slane %v628_v8, %v627_v6 }
 0x29a   : > { %641 = vst.msk [vmem:[%s304_s19] sm:$0x3] %vm639_vm3, %v635_v9 }
 0x29b   : > { %801 = shalt.err (!%p798_p5)
}
 0x29c   : > { %s802_s14 = scalar_lea.hbm %s655_s24, 32  ;;  %s806_s16 = scalar_lea.hbm %s1044_s7, 64 }
 0x29d   : > { %p803_p7 = scmp.ne.s32.totalorder %s655_s24, %s802_s14  ;;  %p807_p12 = scmp.lt.s32.totalorder %s655_s24, %s1044_s7 }
 0x29e   : > { %p808_p13 = scmp.lt.s32.totalorder %s806_s16, %s802_s14 }
 0x29f   : > { %p804_p10 = pnand %p803_p7, %p935_p6 }
 0x2a0   : > { %p809_p0 = por %p808_p13, %p807_p12 }
 0x2a1   : > { %p805_p11 = pneg %p804_p10 }
 0x2a3   : > { %p810_p9 = pnand %p809_p0, %p805_p11 }
 0x2a5   : > { %813 = shalt.err (!%p810_p9)
}
 0x2a6   : > { %744 = dma.vmem_to_hbm [thread:$0]  (%p935_p6), %s658_s20, 32, %s655_s24, %s643_s25  }
 0x2a7 PF: > { %s669_s19 = sand.u32 1, %s836_s26   ;;  %p1048_p1 = scmp.ge.s32.totalorder %s848_s29, 2 }
 0x2a8   : > { %s670_s22 = scalar_lea.sflag [#allocation5], %s669_s19 }
 0x2a9   : > { %p747_p2 = pnand %p1048_p1, %p939_p8 }
 0x2ab   : > { %p748_p3 = pneg %p747_p2 }
 0x2ad   : > { %831 = dma.done.wait (%p748_p3), %s670_s22, 32  }
 0x2ae   : > { %833 = vsyncadd (%p748_p3), %s670_s22, 4294967264  ;;  %p19_p9 = scmp.ge.s32.totalorder %s920_s8, 4   ;;  %s1049_s26 = smov %s840_s27 }
 0x2af   : > { %s1050_s27 = smov %s844_s28  ;;  %s1051_s28 = smov %s933_s11 }
 0x2b0   : > { %s1052_s29 = smov %s920_s8  ;;  %21 = sbr.rel (!%p19_p9) target bundleno = 6 (0x6), region = 111 }
 0x2b5   :  { %675 = vsyncpa [#allocation5], 1 }
 0x2b6   :  { %677 = vsyncpa [#allocation5 + $0x1], 1 }

</bundles_post_ra>
